<compile_context>
chip_gen: v5e
topology: v5e:2x2
jax: 0.10.0
libtpu: 0.0.40
codegen_flags: <defaults>
</compile_context>

<pallas_src>
import functools

import jax
import jax.numpy as jnp
from jax.experimental import pallas as pl
from jax.experimental.pallas import tpu as pltpu


def _round_up(x, m):
    return ((x + m - 1) // m) * m


def _cdiv(a, b):
    return -(-a // b)


def _bf16_eup_ok():
    """bf16 tanh / bf16 MXU inputs only pay off on v6e / v7x."""
    try:
        kind = jax.devices()[0].device_kind.lower()
    except Exception:
        return False
    return ("v6" in kind) or ("v7" in kind)


def rawnet_kernel(x_ref, w1t_ref, b1_ref, w2t_ref, b2_ref, w3t_ref, b3_ref,
                  out_ref, *, use_bf16):
    # x_ref: (2, TN) batch on lanes, f32.
    x = x_ref[...]
    w1t = w1t_ref[...]                                  # (H, 2)

    # fc1 on the VPU: K=2 is far too small for the MXU. Two broadcast FMAs.
    z1 = (w1t[:, 0:1] * x[0:1, :]
          + w1t[:, 1:2] * x[1:2, :]
          + b1_ref[...])                                # (H, TN) f32

    if use_bf16:
        # bf16 tanh (EUP bf16 path) + bf16 MXU inputs with f32 accumulation.
        h1 = jnp.tanh(z1.astype(jnp.bfloat16))          # (H, TN) bf16
        z2 = jnp.dot(w2t_ref[...].astype(jnp.bfloat16), h1,
                     preferred_element_type=jnp.float32) + b2_ref[...]
        h2 = jnp.tanh(z2.astype(jnp.bfloat16))          # (H, TN) bf16
        z3 = jnp.dot(w3t_ref[...].astype(jnp.bfloat16), h2,
                     preferred_element_type=jnp.float32)
        z3 = z3 + b3_ref[0, 0]
        # sigmoid(z) == 0.5*(tanh(z/2)+1): single EUP transcendental.
        t = jnp.tanh((0.5 * z3).astype(jnp.bfloat16)).astype(jnp.float32)
        out = 0.5 * (t + 1.0)
    else:
        # v5e (no bf16 EUP/VPU): stay in f32 end-to-end.
        h1 = jnp.tanh(z1)
        z2 = jnp.dot(w2t_ref[...], h1,
                     preferred_element_type=jnp.float32) + b2_ref[...]
        h2 = jnp.tanh(z2)
        z3 = jnp.dot(w3t_ref[...], h2,
                     preferred_element_type=jnp.float32) + b3_ref[0, 0]
        out = 0.5 * (jnp.tanh(0.5 * z3) + 1.0)

    out_ref[...] = out.astype(out_ref.dtype)


def rawnet_forward(x, params, *, block_n=16384, use_bf16=None):
    """x: (N, 2) float32 -> (N, 1) float32 (sigmoid output)."""
    if use_bf16 is None:
        use_bf16 = _bf16_eup_ok()

    w1, b1, w2, b2, w3, b3 = params
    N = x.shape[0]
    H = w1.shape[1]

    # Layout plumbing only: put the batch on the lane (last) dimension.
    w1t = w1.T                      # (H, 2)
    w2t = w2.T                      # (H, H)
    w3t = w3.T                      # (1, H)
    b1c = b1.reshape(H, 1)
    b2c = b2.reshape(H, 1)
    b3s = b3.reshape(1, 1)

    # Batch tile (lane dim): multiple of 128, at most block_n, and chosen so
    # the grid has >= 2 balanced steps whenever N > 128 (v7x megacore).
    n_min = _round_up(max(N, 1), 128)
    if n_min <= 128:
        tn = 128
    else:
        num_steps = max(2, _cdiv(n_min, block_n))
        tn = _round_up(_cdiv(n_min, num_steps), 128)
    n_pad = _round_up(N, tn)
    grid = (n_pad // tn,)

    # Single pad, then transpose to (2, n_pad) batch-on-lane.
    x_padded = jnp.pad(x, ((0, n_pad - N), (0, 0))) if n_pad != N else x
    xT = x_padded.T

    kernel = functools.partial(rawnet_kernel, use_bf16=use_bf16)

    out_t = pl.pallas_call(
        kernel,
        out_shape=jax.ShapeDtypeStruct((1, n_pad), jnp.float32),
        grid_spec=pltpu.PrefetchScalarGridSpec(
            num_scalar_prefetch=0,
            grid=grid,
            in_specs=[
                pl.BlockSpec((2, tn), lambda i: (0, i)),      # x tile (streamed)
                pl.BlockSpec((H, 2), lambda i: (0, 0)),       # w1^T (resident)
                pl.BlockSpec((H, 1), lambda i: (0, 0)),       # b1
                pl.BlockSpec((H, H), lambda i: (0, 0)),       # w2^T
                pl.BlockSpec((H, 1), lambda i: (0, 0)),       # b2
                pl.BlockSpec((1, H), lambda i: (0, 0)),       # w3^T
                pl.BlockSpec(memory_space=pltpu.MemorySpace.SMEM),  # b3 scalar
            ],
            out_specs=pl.BlockSpec((1, tn), lambda i: (0, i)),
        ),
        compiler_params=pltpu.CompilerParams(
            dimension_semantics=("parallel",)),
    )(xT, w1t, b1c, w2t, b2c, w3t, b3s)

    # Back to the module's (N, 1) output layout without an extra transpose.
    return out_t[0, :N].reshape(N, 1)


def init_params(key, num_hid):
    """Deterministic init mirroring nn.Linear's U(-1/sqrt(fan_in), +1/sqrt(fan_in))."""
    def linear(key, fan_in, fan_out):
        kw, kb = jax.random.split(key)
        bound = 1.0 / jnp.sqrt(fan_in)
        w = jax.random.uniform(kw, (fan_in, fan_out), jnp.float32, -bound, bound)
        b = jax.random.uniform(kb, (1, fan_out), jnp.float32, -bound, bound)
        return w, b

    k1, k2, k3 = jax.random.split(key, 3)
    w1, b1 = linear(k1, 2, num_hid)
    w2, b2 = linear(k2, num_hid, num_hid)
    w3, b3 = linear(k3, num_hid, 1)
    return (w1, b1, w2, b2, w3, b3)


def rawnet_reference(x, params):
    # NOTE: the PyTorch module also stashes (hid1, hid2) in self.hids; those
    # are intermediates of this same computation and not part of the returned
    # forward value, so the kernel does not emit them.
    w1, b1, w2, b2, w3, b3 = params
    h1 = jnp.tanh(x @ w1 + b1)
    h2 = jnp.tanh(h1 @ w2 + b2)
    return jax.nn.sigmoid(h2 @ w3 + b3)


if __name__ == "__main__":
    num_hid = 32

    key = jax.random.PRNGKey(0)
    k_x, k_x2, k_p = jax.random.split(key, 3)
    params = init_params(k_p, num_hid)

    use_bf16 = _bf16_eup_ok()
    # bf16 tanh / bf16 matmul inputs (v6e/v7x) -> relax tolerance accordingly.
    atol = 3e-2 if use_bf16 else 1e-5

    # Small case (matches the module's toy usage): batch=8, in_features=2.
    x_small = jax.random.normal(k_x, (8, 2), jnp.float32)
    out_small = jax.block_until_ready(rawnet_forward(x_small, params))
    ref_small = rawnet_reference(x_small, params)
    assert out_small.shape == (8, 1)
    assert jnp.allclose(out_small, ref_small, atol=atol, rtol=atol), \
        "mismatch vs reference (small)"

    # Larger case exercising the multi-step batch grid + padding path
    # (and the >=2-grid-step megacore tiling).
    x_big = jax.random.normal(k_x2, (1000, 2), jnp.float32)
    out_big = jax.block_until_ready(rawnet_forward(x_big, params, block_n=256))
    ref_big = rawnet_reference(x_big, params)
    assert out_big.shape == (1000, 1)
    assert jnp.allclose(out_big, ref_big, atol=atol, rtol=atol), \
        "mismatch vs reference (tiled)"

    # Default large-tile path as well.
    out_big2 = jax.block_until_ready(rawnet_forward(x_big, params))
    assert jnp.allclose(out_big2, ref_big, atol=atol, rtol=atol), \
        "mismatch vs reference (large tile)"

    print("KERNEL_OK")
</pallas_src>

<mosaic_0001>
module attributes {stable_mosaic.version = 11 : i64} {
  func.func @rawnet_kernel(%arg0: i32, %arg1: memref<2x128xf32, #tpu.memory_space<vmem>>, %arg2: memref<32x2xf32, #tpu.memory_space<vmem>>, %arg3: memref<32x1xf32, #tpu.memory_space<vmem>>, %arg4: memref<32x32xf32, #tpu.memory_space<vmem>>, %arg5: memref<32x1xf32, #tpu.memory_space<vmem>>, %arg6: memref<1x32xf32, #tpu.memory_space<vmem>>, %arg7: memref<1x1xf32, #tpu.memory_space<smem>>, %arg8: memref<1x128xf32, #tpu.memory_space<vmem>>) attributes {dimension_semantics = [#tpu.dimension_semantics<parallel>], iteration_bounds = array<i64: 1>, scalar_prefetch = 0 : i64, scratch_operands = 0 : i64, tpu.core_type = #tpu.core_type<tc>, window_params = [{transform_indices = @transform_0, window_bounds = array<i64: 2, 128>}, {pipeline_mode = #tpu.pipeline_mode<synchronous>, transform_indices = @transform_1, window_bounds = array<i64: 32, 2>}, {pipeline_mode = #tpu.pipeline_mode<synchronous>, transform_indices = @transform_2, window_bounds = array<i64: 32, 1>}, {pipeline_mode = #tpu.pipeline_mode<synchronous>, transform_indices = @transform_3, window_bounds = array<i64: 32, 32>}, {pipeline_mode = #tpu.pipeline_mode<synchronous>, transform_indices = @transform_4, window_bounds = array<i64: 32, 1>}, {pipeline_mode = #tpu.pipeline_mode<synchronous>, transform_indices = @transform_5, window_bounds = array<i64: 1, 32>}, {transform_indices = @transform_6, window_bounds = array<i64: 1, 1>}, {transform_indices = @transform_7, window_bounds = array<i64: 1, 128>}]} {
    %c0 = arith.constant 0 : index
    %c0_0 = arith.constant 0 : index
    %0 = vector.load %arg1[%c0, %c0_0] : memref<2x128xf32, #tpu.memory_space<vmem>>, vector<2x128xf32>
    %c0_1 = arith.constant 0 : index
    %c0_2 = arith.constant 0 : index
    %1 = vector.load %arg2[%c0_1, %c0_2] : memref<32x2xf32, #tpu.memory_space<vmem>>, vector<32x2xf32>
    %2 = vector.extract_strided_slice %1 {offsets = [0, 0], sizes = [32, 1], strides = [1, 1]} : vector<32x2xf32> to vector<32x1xf32>
    %3 = vector.extract_strided_slice %0 {offsets = [0, 0], sizes = [1, 128], strides = [1, 1]} : vector<2x128xf32> to vector<1x128xf32>
    %4 = vector.broadcast %2 : vector<32x1xf32> to vector<32x128xf32>
    %5 = vector.broadcast %3 : vector<1x128xf32> to vector<32x128xf32>
    %6 = arith.mulf %4, %5 : vector<32x128xf32>
    %7 = vector.extract_strided_slice %1 {offsets = [0, 1], sizes = [32, 1], strides = [1, 1]} : vector<32x2xf32> to vector<32x1xf32>
    %8 = vector.extract_strided_slice %0 {offsets = [1, 0], sizes = [1, 128], strides = [1, 1]} : vector<2x128xf32> to vector<1x128xf32>
    %9 = vector.broadcast %7 : vector<32x1xf32> to vector<32x128xf32>
    %10 = vector.broadcast %8 : vector<1x128xf32> to vector<32x128xf32>
    %11 = arith.mulf %9, %10 : vector<32x128xf32>
    %12 = arith.addf %6, %11 : vector<32x128xf32>
    %c0_3 = arith.constant 0 : index
    %c0_4 = arith.constant 0 : index
    %13 = vector.load %arg3[%c0_3, %c0_4] : memref<32x1xf32, #tpu.memory_space<vmem>>, vector<32x1xf32>
    %14 = vector.broadcast %13 : vector<32x1xf32> to vector<32x128xf32>
    %15 = arith.addf %12, %14 : vector<32x128xf32>
    %16 = math.tanh %15 : vector<32x128xf32>
    %c0_5 = arith.constant 0 : index
    %c0_6 = arith.constant 0 : index
    %17 = vector.load %arg4[%c0_5, %c0_6] : memref<32x32xf32, #tpu.memory_space<vmem>>, vector<32x32xf32>
    %cst = arith.constant dense<0.000000e+00> : vector<32x128xf32>
    %18 = tpu.matmul %17, %16, %cst {dimension_numbers = #tpu.dot_dimension_numbers<[1], [0], [0], [1], [0, 0, 1, 1], [], []>} : vector<32x32xf32>, vector<32x128xf32>, vector<32x128xf32> -> vector<32x128xf32>
    %c0_7 = arith.constant 0 : index
    %c0_8 = arith.constant 0 : index
    %19 = vector.load %arg5[%c0_7, %c0_8] : memref<32x1xf32, #tpu.memory_space<vmem>>, vector<32x1xf32>
    %20 = vector.broadcast %19 : vector<32x1xf32> to vector<32x128xf32>
    %21 = arith.addf %18, %20 : vector<32x128xf32>
    %22 = math.tanh %21 : vector<32x128xf32>
    %c0_9 = arith.constant 0 : index
    %c0_10 = arith.constant 0 : index
    %23 = vector.load %arg6[%c0_9, %c0_10] : memref<1x32xf32, #tpu.memory_space<vmem>>, vector<1x32xf32>
    %cst_11 = arith.constant dense<0.000000e+00> : vector<1x128xf32>
    %24 = tpu.matmul %23, %22, %cst_11 {dimension_numbers = #tpu.dot_dimension_numbers<[1], [0], [0], [1], [0, 0, 1, 1], [], []>} : vector<1x32xf32>, vector<32x128xf32>, vector<1x128xf32> -> vector<1x128xf32>
    %c0_12 = arith.constant 0 : index
    %c0_13 = arith.constant 0 : index
    %25 = memref.load %arg7[%c0_12, %c0_13] : memref<1x1xf32, #tpu.memory_space<smem>>
    %26 = vector.broadcast %25 : f32 to vector<1x128xf32>
    %27 = arith.addf %24, %26 : vector<1x128xf32>
    %cst_14 = arith.constant 5.000000e-01 : f32
    %28 = vector.broadcast %cst_14 : f32 to vector<1x128xf32>
    %29 = arith.mulf %28, %27 : vector<1x128xf32>
    %30 = math.tanh %29 : vector<1x128xf32>
    %cst_15 = arith.constant 1.000000e+00 : f32
    %31 = vector.broadcast %cst_15 : f32 to vector<1x128xf32>
    %32 = arith.addf %30, %31 : vector<1x128xf32>
    %cst_16 = arith.constant 5.000000e-01 : f32
    %33 = vector.broadcast %cst_16 : f32 to vector<1x128xf32>
    %34 = arith.mulf %33, %32 : vector<1x128xf32>
    %c0_17 = arith.constant 0 : index
    %c0_18 = arith.constant 0 : index
    %35 = vector.load %arg8[%c0_17, %c0_18] : memref<1x128xf32, #tpu.memory_space<vmem>>, vector<1x128xf32>
    tpu.vector_store %arg8[%c0_17, %c0_18], %34 {strides = array<i32>} : memref<1x128xf32, #tpu.memory_space<vmem>>, vector<1x128xf32>,
    return
  }
  func.func @transform_0(%arg0: i32) -> (i32, i32) {
    %c0_i32 = arith.constant 0 : i32
    %c0_i32_0 = arith.constant 0 : i32
    return %c0_i32, %arg0 : i32, i32
  }
  func.func @transform_1(%arg0: i32) -> (i32, i32) {
    %c0_i32 = arith.constant 0 : i32
    %c0_i32_0 = arith.constant 0 : i32
    %c0_i32_1 = arith.constant 0 : i32
    return %c0_i32, %c0_i32_0 : i32, i32
  }
  func.func @transform_2(%arg0: i32) -> (i32, i32) {
    %c0_i32 = arith.constant 0 : i32
    %c0_i32_0 = arith.constant 0 : i32
    %c0_i32_1 = arith.constant 0 : i32
    return %c0_i32, %c0_i32_0 : i32, i32
  }
  func.func @transform_3(%arg0: i32) -> (i32, i32) {
    %c0_i32 = arith.constant 0 : i32
    %c0_i32_0 = arith.constant 0 : i32
    %c0_i32_1 = arith.constant 0 : i32
    return %c0_i32, %c0_i32_0 : i32, i32
  }
  func.func @transform_4(%arg0: i32) -> (i32, i32) {
    %c0_i32 = arith.constant 0 : i32
    %c0_i32_0 = arith.constant 0 : i32
    %c0_i32_1 = arith.constant 0 : i32
    return %c0_i32, %c0_i32_0 : i32, i32
  }
  func.func @transform_5(%arg0: i32) -> (i32, i32) {
    %c0_i32 = arith.constant 0 : i32
    %c0_i32_0 = arith.constant 0 : i32
    %c0_i32_1 = arith.constant 0 : i32
    return %c0_i32, %c0_i32_0 : i32, i32
  }
  func.func @transform_6(%arg0: i32) -> (i32, i32) {
    %c0_i32 = arith.constant 0 : i32
    %c0_i32_0 = arith.constant 0 : i32
    %c0_i32_1 = arith.constant 0 : i32
    return %c0_i32, %c0_i32_0 : i32, i32
  }
  func.func @transform_7(%arg0: i32) -> (i32, i32) {
    %c0_i32 = arith.constant 0 : i32
    %c0_i32_0 = arith.constant 0 : i32
    return %c0_i32, %arg0 : i32, i32
  }
}

</mosaic_0001>

<bundles_post_ra>
// kernel: tpu_custom_call.1
= control target key start
LH: loop header
LB: loop body
LE: loop exit
PB: predicated region body
PF: predicated region fallthrough
CT: control target
= control target key end

     0   :  { %v305_v2 = vmov 0   ;;  %s413_s0 = inlined_call_operand.vmem [shape: f32[2,128], index: 0, kind: input, shape index: {}]   ;;  %s414_s1 = inlined_call_operand.vmem [shape: f32[32,2], index: 1, kind: input, shape index: {}]   ;;  %s415_s2 = inlined_call_operand.vmem [shape: f32[32,1], index: 2, kind: input, shape index: {}]   ;;  %s416_s3 = inlined_call_operand.vmem [shape: f32[32,32], index: 3, kind: input, shape index: {}]   ;;  %s417_s4 = inlined_call_operand.vmem [shape: f32[32,1], index: 4, kind: input, shape index: {}]   ;;  %s418_s5 = inlined_call_operand.vmem [shape: f32[1,32], index: 5, kind: input, shape index: {}]   ;;  %s419_s6 = inlined_call_operand.<no memory space> [shape: f32[1,1], index: 6, kind: input, shape index: {}]   ;;  %s420_s7 = inlined_call_operand.hbm [shape: f32[1,128], index: 7, kind: output, shape index: {}]  }
   0x1   :  { %v32_v0 = vld [vmem:[%s414_s1 + $0x18] sm:$0xff]  ;;  %v31_v1 = vld [vmem:[%s414_s1 + $0x10] sm:$0xff]  ;;  %254 = vset.pattern.permute.xlu1 %v305_v2  ;;  %252 = vset.pattern.permute.xlu0 %v305_v2  ;;  %v30_v3 = vld [vmem:[%s414_s1 + $0x8] sm:$0xff] }
   0x2   :  { %50 = vperm.xlu0 %252, %v32_v0   ;;  %45 = vperm.xlu1 %254, %v31_v1  }
   0x3   :  { %256 = vset.pattern.permute.xlu2 %v305_v2 }
   0x4   :  { %13 = vsyncpa [#allocation4], 0  ;;  %40 = vperm.xlu2 %256, %v30_v3   ;;  %v306_v4 = vmov 1   ;;  %v29_v5 = vld [vmem:[%s414_s1] sm:$0xff]  ;;  %v86_v6 = vld [vmem:[%s415_s2 + $0x18] sm:$0xff]  ;;  %vm143_vm0 = vcmask 261120  }
   0x5   :  { %v85_v7 = vld [vmem:[%s415_s2 + $0x10] sm:$0xff]  ;;  %v83_v8 = vld [vmem:[%s415_s2] sm:$0xff]  ;;  %v84_v9 = vld [vmem:[%s415_s2 + $0x8] sm:$0xff]  ;;  %s307_s11 = smov [#allocation3]   ;;  %s227_s15 = sshll.u32 %s420_s7, 4  ;;  %s228_s15 = int_to_ptr.hbm [resolvable:$true] %s227_s15 }
   0x6   :  { %v122_v10 = vld [vmem:[%s417_s4 + $0x18] sm:$0xff]  ;;  %v121_v11 = vld [vmem:[%s417_s4 + $0x10] sm:$0xff]  ;;  %v120_v12 = vld [vmem:[%s417_s4 + $0x8] sm:$0xff]  ;;  %s225_s12 = sshll.u32 %s307_s11, 4  ;;  %s226_s12 = int_to_ptr.vmem [resolvable:$true] %s225_s12 }
   0x7   :  { %v119_v13 = vld [vmem:[%s417_s4] sm:$0xff]  ;;  %v116_v50 = vld [vmem:[%s416_s3 + $0x8] sm:$0xff]  ;;  %v117_v51 = vld [vmem:[%s416_s3 + $0x10] sm:$0xff] }
   0x8   :  { %v28_v20 = vld [vmem:[%s413_s0] sm:$0x3]  ;;  %v118_v52 = vld [vmem:[%s416_s3 + $0x18] sm:$0xff] }
   0x9   :  { %v74_v21 = vperm.slane %v28_v20, 1  ;;  %v53_v22 = vperm.slane %v28_v20, 0  ;;  %v115_v48 = vld [vmem:[%s416_s3] sm:$0xff] }
   0xa   :  { %253 = vset.pattern.permute.xlu0 %v306_v4  ;;  %255 = vset.pattern.permute.xlu1 %v306_v4 }
   0xb   :  { %71 = vperm.xlu0 %253, %v32_v0   ;;  %67 = vperm.xlu1 %255, %v31_v1  }
   0xc   :  { %257 = vset.pattern.permute.xlu2 %v306_v4  ;;  %v189_v4 = vld [vmem:[%s418_s5] sm:$0x1] }
   0xd   :  { %63 = vperm.xlu2 %257, %v30_v3  }
  0x13   :  { %258 = vset.pattern.permute.xlu1 %v305_v2  ;;  %59 = vperm.xlu0 %253, %v29_v5  }
  0x14   :  { %104 = vperm.xlu1 %258, %v86_v6   ;;  %v191_v6 = vstv %s419_s6 }
  0x15   :  { %259 = vset.pattern.permute.xlu2 %v305_v2 }
  0x16   :  { %35 = vperm.xlu2 %259, %v29_v5  }
  0x1b   :  { %260 = vset.pattern.permute.xlu0 %v305_v2 }
  0x1c   :  { %99 = vperm.xlu1 %258, %v85_v7   ;;  %89 = vperm.xlu0 %260, %v83_v8  }
  0x1e   :  { %94 = vperm.xlu2 %259, %v84_v9  }
  0x24   :  { %140 = vperm.xlu1 %258, %v122_v10  }
  0x26   :  { %135 = vperm.xlu2 %259, %v121_v11  }
  0x2c   :  { %130 = vperm.xlu1 %258, %v120_v12  }
  0x2e   :  { %125 = vperm.xlu2 %259, %v119_v13  }
  0x5e   :  { %v41_v14 = vpop.permute.xlu2 %40 }
  0x5f   :  { %v55_v29 = vmul.f32 %v53_v22, %v41_v14 }
  0x67   :  { %v64_v17 = vpop.permute.xlu2 %63 }
  0x68   :  { %v76_v30 = vmul.f32 %v74_v21, %v64_v17 }
  0x6a   :  { %v80_v35 = vadd.f32 %v76_v30, %v55_v29 }
  0x70   :  { %v36_v24 = vpop.permute.xlu2 %35 }
  0x71   :  { %v54_v33 = vmul.f32 %v53_v22, %v36_v24 }
  0x74   :  { %v46_v15 = vpop.permute.xlu1 %45  ;;  %v51_v16 = vpop.permute.xlu0 %50 }
  0x75   :  { %v57_v25 = vmul.f32 %v53_v22, %v51_v16  ;;  %v56_v34 = vmul.f32 %v53_v22, %v46_v15 }
  0x78   :  { %v95_v37 = vpop.permute.xlu2 %94 }
  0x79   :  { %v108_v42 = vadd.f32 %v95_v37, %v80_v35 }
  0x7d   :  { %v72_v18 = vpop.permute.xlu0 %71  ;;  %v68_v19 = vpop.permute.xlu1 %67 }
  0x7e   :  { %v78_v23 = vmul.f32 %v74_v21, %v72_v18  ;;  %v77_v32 = vmul.f32 %v74_v21, %v68_v19 }
  0x80   :  { %v82_v27 = vadd.f32 %v78_v23, %v57_v25  ;;  %v81_v38 = vadd.f32 %v77_v32, %v56_v34  ;;  %v136_v55 = vpop.permute.xlu2 %135 }
  0x85   :  { %v60_v26 = vpop.permute.xlu0 %59 }
  0x86   :  { %v105_v28 = vpop.permute.xlu1 %104  ;;  %v75_v36 = vmul.f32 %v74_v21, %v60_v26 }
  0x87   :  { %v110_v31 = vadd.f32 %v105_v28, %v82_v27 }
  0x88   :  { %v79_v44 = vadd.f32 %v75_v36, %v54_v33  ;;  %v126_v63 = vpop.permute.xlu2 %125 }
  0x89   :  { %261 = vtanh.f32 %v110_v31 }
  0x8e   :  { %v100_v39 = vpop.permute.xlu1 %99  ;;  %v90_v40 = vpop.permute.xlu0 %89 }
  0x8f   :  { %v262_v41 = vpop.eup %261  ;;  %v109_v43 = vadd.f32 %v100_v39, %v81_v38  ;;  %v107_v45 = vadd.f32 %v90_v40, %v79_v44 }
  0x90   :  { %168 = vmatpush.msra.mxu0 %v262_v41  ;;  %241 = vmatpush.msra.mxu2 %v262_v41 }
  0x91   :  { %263 = vtanh.f32 %v109_v43  ;;  %242 = vmatpush.msra.mxu3 %v262_v41 }
  0x92   :  { %265 = vtanh.f32 %v108_v42 }
  0x93   :  { %267 = vtanh.f32 %v107_v45 }
  0x96   :  { %v141_v53 = vpop.permute.xlu1 %140 }
  0x97   :  { %v264_v46 = vpop.eup %263 }
  0x98   :  { %169 = vmatpush.msra.mxu0 %v264_v46  ;;  %243 = vmatpush.msra.mxu2 %v264_v46  ;;  %v266_v47 = vpop.eup %265 }
  0x99   :  { %244 = vmatpush.msra.mxu3 %v264_v46  ;;  %v268_v49 = vpop.eup %267 }
  0x9a   :  { %170 = vmatpush.msra.mxu0 %v266_v47  ;;  %245 = vmatpush.msra.mxu2 %v266_v47 }
  0x9b   :  { %246 = vmatpush.msra.mxu3 %v266_v47 }
  0x9c   :  { %171 = vmatpush.msra.mxu0 %v268_v49  ;;  %247 = vmatpush.msra.mxu2 %v268_v49 }
  0x9d   :  { %248 = vmatpush.msra.mxu3 %v268_v49  ;;  %236 = vmatmul.msk.f32.vlgmr.msra.gmra.mxu0 %vm143_vm0, %v115_v48 }
  0x9e   :  { %237 = vmatmul.msk.f32.vlgmr.msra.gmra.mxu2 %vm143_vm0, %v116_v50  ;;  %238 = vmatmul.msk.f32.vlgmr.msra.gmra.mxu3 %vm143_vm0, %v117_v51  ;;  %v131_v60 = vpop.permute.xlu1 %130 }
  0xa6   :  { %239 = vmatmul.msk.f32.gmra.mxu3 %vm143_vm0, %v118_v52 }
 0x11a   :  { %v173_v61 = vpop.f32.mrf.mxu0 }
 0x11b   :  { %v174_v0 = vadd.f32 %v173_v61, %v126_v63 }
 0x121   :  { %v179_v54 = vpop.f32.mrf.mxu3  ;;  %v176_v56 = vpop.f32.mrf.mxu2 }
 0x122   :  { %v180_v58 = vadd.f32 %v179_v54, %v136_v55  ;;  %v177_v62 = vadd.f32 %v176_v56, %v131_v60 }
 0x129   :  { %v182_v57 = vpop.f32.mrf.mxu3 }
 0x12a   :  { %v183_v59 = vadd.f32 %v182_v57, %v141_v53 }
 0x12c   :  { %269 = vtanh.f32 %v183_v59 }
 0x12d   :  { %271 = vtanh.f32 %v180_v58 }
 0x12e   :  { %273 = vtanh.f32 %v177_v62 }
 0x12f   :  { %275 = vtanh.f32 %v174_v0 }
 0x132   :  { %v270_v1 = vpop.eup %269 }
 0x133   :  { %207 = vmatpush.msra.mxu1 %v270_v1  ;;  %v272_v2 = vpop.eup %271 }
 0x134   :  { %v274_v3 = vpop.eup %273 }
 0x135   :  { %208 = vmatpush.msra.mxu1 %v272_v2  ;;  %v276_v5 = vpop.eup %275 }
 0x137   :  { %209 = vmatpush.msra.mxu1 %v274_v3 }
 0x139   :  { %210 = vmatpush.msra.mxu1 %v276_v5 }
 0x13a   :  { %240 = vmatmul.msk.f32.vlgmr.msra.gmra.mxu1 %vm143_vm0, %v189_v4 }
 0x1b7   :  { %v212_v7 = vpop.f32.mrf.mxu1 }
 0x1b8   :  { %v213_v8 = vadd.f32 %v212_v7, %v191_v6 }
 0x1ba   :  { %v215_v9 = vmul.f32 0.5, %v213_v8 }
 0x1bc   :  { %277 = vtanh.f32 %v215_v9 }
 0x1c2   :  { %v278_v10 = vpop.eup %277 }
 0x1c3   :  { %v217_v11 = vadd.f32 1.0, %v278_v10 }
 0x1c5   :  { %v218_v12 = vmul.f32 0.5, %v217_v11 }
 0x1c7   :  { %219 = vst [vmem:[#allocation3] sm:$0x1] %v218_v12 }
 0x1c8   :  { %230 = dma.vmem_to_hbm [thread:$0]  %s226_s12, 16, %s228_s15, [#allocation4]  }
 0x1c9   :  { %303 = dma.done.wait [#allocation4], 16  }
 0x1ca   :  { %304 = vsyncadd [#allocation4], 4294967280 }
 0x1cb   :  { %235 = vsyncpa [#allocation4], 1 }

</bundles_post_ra>
